<compile_context>
chip_gen: v5e
topology: v5e:2x2
jax: 0.10.0
libtpu: 0.0.40
codegen_flags: <defaults>
</compile_context>

<pallas_src>
import jax
import jax.numpy as jnp
import numpy as np
from jax import lax
from jax.experimental import pallas as pl
from jax.experimental.pallas import tpu as pltpu

KERNEL_SIZES = (3, 5, 7, 11)
OUT_PER_BRANCH = 64
NUM_OUT = OUT_PER_BRANCH * len(KERNEL_SIZES)   # 256
NUM_TAPS = max(KERNEL_SIZES)                   # 11
PMAX = NUM_TAPS // 2                           # 5

TL_DEFAULT = 2048                              # L tile (lane axis), multiple of 128
VMEM_BUDGET_BYTES = 24 * 1024 * 1024           # stay under the 32 MiB scoped default
VMEM_LIMIT_BYTES = 32 * 1024 * 1024


def _round_up(n, m):
    return -(-n // m) * m


def _msfe_kernel(x_ref, h_ref, w_ref, o_ref, win_ref, lhs_ref):
    # x_ref   : (1, c_pad, TL)             main input tile (NCL, channel-padded, f32)
    # h_ref   : (1, c_pad, 128)            right halo (next 128 padded positions)
    # w_ref   : (256, NUM_TAPS * c_pad)    fused conv weight (+bias column), compute dtype
    # o_ref   : (1, 256, TL)               output tile, NCL layout
    # win_ref : (c_pad, TL + 128)          scratch: stitched window (compute dtype)
    # lhs_ref : (NUM_TAPS*c_pad, TL)       scratch: transposed im2col slab (compute dtype)
    tl = o_ref.shape[2]
    c_pad = x_ref.shape[1]
    cdt = w_ref.dtype

    # Stitch main tile + halo into the window scratch (no concatenate copy).
    win_ref[:, :tl] = x_ref[0].astype(cdt)
    win_ref[:, tl:] = h_ref[0].astype(cdt)
    window = win_ref[...]                                          # (c_pad, TL+128)

    # im2col (transposed): row block j holds the window shifted left by j positions.
    for j in range(NUM_TAPS):
        lhs_ref[j * c_pad:(j + 1) * c_pad, :] = window[:, j:j + tl]

    # Single fused MXU matmul for all 4 branches / all taps (bias folded in).
    acc = jnp.dot(w_ref[...], lhs_ref[...],
                  preferred_element_type=jnp.float32)              # (256, TL) f32
    o_ref[0] = jnp.maximum(acc, 0.0).astype(o_ref.dtype)           # ReLU, NCL store


def _fuse_params(params, c_in, c_pad):
    """Fuse per-branch Conv1d params (w:(64,C_in,K), b:(64,)) into one
    (256, NUM_TAPS*c_pad) weight; column index = tap*c_pad + chan.
    The bias is written into the centre-tap column of the constant-ones channel c_in."""
    blocks = []
    for K in KERNEL_SIZES:
        w, b = params[K]
        p = K // 2
        # zero-pad channels to c_pad and taps to the centred 11-tap window
        w_full = jnp.pad(w, ((0, 0), (0, c_pad - c_in), (PMAX - p, PMAX - p)))
        w_full = w_full.at[:, c_in, PMAX].set(b)       # bias via ones-channel, centre tap
        blocks.append(jnp.transpose(w_full, (0, 2, 1))
                      .reshape(OUT_PER_BRANCH, NUM_TAPS * c_pad))
    return jnp.concatenate(blocks, axis=0)             # (256, 11*c_pad)


def _clamp_tl_to_vmem(tl, c_pad, compute_itemsize, out_itemsize, budget_bytes):
    """Shrink TL until the double-buffered working set fits the VMEM budget."""
    def est(t):
        in_b = 2 * (c_pad * t * 4 + c_pad * 128 * 4)                     # x tile + halo
        w_b = 2 * NUM_OUT * NUM_TAPS * c_pad * compute_itemsize          # fused weight
        o_b = 2 * NUM_OUT * t * out_itemsize                             # output tile
        s_b = (c_pad * (t + 128) + NUM_TAPS * c_pad * t) * compute_itemsize
        return in_b + w_b + o_b + s_b
    while tl > 256 and est(tl) > budget_bytes:
        tl = _round_up(tl // 2, 128)
    return tl


def multi_scale_feature_extractor(x_ncl, params, *, tl=TL_DEFAULT,
                                  compute_dtype=jnp.float32,
                                  out_dtype=jnp.float32):
    """x_ncl: (B, C_in, L) f32 -> (B, 256, L) (PyTorch NCL layout, no transpose)."""
    B, C_in, L = x_ncl.shape
    c_pad = _round_up(C_in + 1, 8)          # +1 for the constant-ones bias channel
    tl = _round_up(min(tl, _round_up(L, 128)), 128)
    tl = _clamp_tl_to_vmem(tl, c_pad,
                           np.dtype(compute_dtype).itemsize,
                           np.dtype(out_dtype).itemsize,
                           VMEM_BUDGET_BYTES)
    num_l = -(-L // tl)
    l_round = num_l * tl
    tlb = tl // 128
    lp = l_round + 128                      # padded length: every tile + halo in-bounds

    w_fused = _fuse_params(params, C_in, c_pad).astype(compute_dtype)

    # PMAX zeros on the left give 'same' padding; right/channel zeros are halo/sublane pad.
    # TODO(synk): for large C_in, handle edge zero-fill in-kernel to drop this HBM pass.
    x_padded = jnp.pad(x_ncl, ((0, 0), (0, c_pad - C_in), (PMAX, lp - PMAX - L)))
    # Constant-ones channel: its centre-tap weight column carries each branch's bias.
    x_padded = x_padded.at[:, C_in, :].set(1.0)

    out = pl.pallas_call(
        _msfe_kernel,
        out_shape=jax.ShapeDtypeStruct((B, NUM_OUT, l_round), out_dtype),
        grid_spec=pltpu.PrefetchScalarGridSpec(
            num_scalar_prefetch=0,
            grid=(B, num_l),
            in_specs=[
                pl.BlockSpec((1, c_pad, tl), lambda b, l: (b, 0, l)),
                pl.BlockSpec((1, c_pad, 128), lambda b, l: (b, 0, (l + 1) * tlb)),
                pl.BlockSpec((NUM_OUT, NUM_TAPS * c_pad), lambda b, l: (0, 0)),
            ],
            out_specs=pl.BlockSpec((1, NUM_OUT, tl), lambda b, l: (b, 0, l)),
            scratch_shapes=[
                pltpu.VMEM((c_pad, tl + 128), compute_dtype),
                pltpu.VMEM((NUM_TAPS * c_pad, tl), compute_dtype),
            ],
        ),
        compiler_params=pltpu.CompilerParams(
            dimension_semantics=("parallel", "parallel"),
            vmem_limit_bytes=VMEM_LIMIT_BYTES),
    )(x_padded, x_padded, w_fused)

    if l_round != L:
        out = out[:, :, :L]
    return out


def init_params(key, in_channels):
    """Deterministic synthetic Conv1d params in PyTorch layout: w (64, C_in, K), b (64,)."""
    params = {}
    for K in KERNEL_SIZES:
        key, kw, kb = jax.random.split(key, 3)
        bound = 1.0 / (in_channels * K) ** 0.5
        w = jax.random.uniform(kw, (OUT_PER_BRANCH, in_channels, K),
                               jnp.float32, -bound, bound)
        b = jax.random.uniform(kb, (OUT_PER_BRANCH,), jnp.float32, -bound, bound)
        params[K] = (w, b)
    return params


def _reference(x_ncl, params):
    """Pure-JAX reference (lax.conv_general_dilated, NCL like PyTorch)."""
    outs = []
    for K in KERNEL_SIZES:
        w, b = params[K]                                    # (64, C_in, K), (64,)
        y = lax.conv_general_dilated(
            x_ncl, w, window_strides=(1,), padding=((K // 2, K // 2),),
            dimension_numbers=("NCH", "OIH", "NCH"))
        y = y + b[None, :, None]
        outs.append(jnp.maximum(y, 0.0))
    return jnp.concatenate(outs, axis=1)


if __name__ == "__main__":
    key = jax.random.PRNGKey(0)
    key, kx = jax.random.split(key)

    # Small single-tile case.
    B, C_in, L = 2, 4, 16
    x = jax.random.normal(kx, (B, C_in, L), jnp.float32)
    params = init_params(key, C_in)

    out = jax.block_until_ready(multi_scale_feature_extractor(x, params))
    assert out.shape == (B, NUM_OUT, L), out.shape
    ref = jax.block_until_ready(_reference(x, params))
    assert jnp.allclose(out, ref, atol=1e-3, rtol=1e-3), \
        float(jnp.max(jnp.abs(out - ref)))

    # Multi-tile path: cross-tile halo, ragged tail, and C_in already a multiple of 8
    # (exercises the extra-channel-group path for the folded bias).
    key, kx2, kp2 = jax.random.split(key, 3)
    B2, C2, L2 = 2, 8, 200
    x2 = jax.random.normal(kx2, (B2, C2, L2), jnp.float32)
    params2 = init_params(kp2, C2)
    out2 = jax.block_until_ready(multi_scale_feature_extractor(x2, params2, tl=128))
    assert out2.shape == (B2, NUM_OUT, L2), out2.shape
    ref2 = jax.block_until_ready(_reference(x2, params2))
    assert jnp.allclose(out2, ref2, atol=1e-3, rtol=1e-3), \
        float(jnp.max(jnp.abs(out2 - ref2)))

    # bf16 MXU-input path (v6e/v7x compute lever); f32 accumulation, looser tolerance.
    out3 = jax.block_until_ready(
        multi_scale_feature_extractor(x2, params2, tl=128,
                                      compute_dtype=jnp.bfloat16))
    assert out3.shape == (B2, NUM_OUT, L2), out3.shape
    assert jnp.allclose(out3, ref2, atol=5e-2, rtol=5e-2), \
        float(jnp.max(jnp.abs(out3 - ref2)))

    print("KERNEL_OK")
</pallas_src>

<mosaic_0001>
module attributes {stable_mosaic.version = 11 : i64} {
  func.func @_msfe_kernel(%arg0: i32, %arg1: i32, %arg2: memref<1x8x128xf32, #tpu.memory_space<vmem>>, %arg3: memref<1x8x128xf32, #tpu.memory_space<vmem>>, %arg4: memref<256x88xf32, #tpu.memory_space<vmem>>, %arg5: memref<1x256x128xf32, #tpu.memory_space<vmem>>, %arg6: memref<8x256xf32, #tpu.memory_space<vmem>>, %arg7: memref<88x128xf32, #tpu.memory_space<vmem>>) attributes {dimension_semantics = [#tpu.dimension_semantics<parallel>, #tpu.dimension_semantics<parallel>], iteration_bounds = array<i64: 2, 1>, scalar_prefetch = 0 : i64, scratch_operands = 2 : i64, tpu.core_type = #tpu.core_type<tc>, window_params = [{transform_indices = @transform_0, window_bounds = array<i64: 1, 8, 128>}, {transform_indices = @transform_1, window_bounds = array<i64: 1, 8, 128>}, {pipeline_mode = #tpu.pipeline_mode<synchronous>, transform_indices = @transform_2, window_bounds = array<i64: 256, 88>}, {transform_indices = @transform_3, window_bounds = array<i64: 1, 256, 128>}]} {
    %c0 = arith.constant 0 : index
    %c0_0 = arith.constant 0 : index
    %c0_1 = arith.constant 0 : index
    %0 = vector.load %arg2[%c0, %c0_0, %c0_1] : memref<1x8x128xf32, #tpu.memory_space<vmem>>, vector<1x8x128xf32>
    %1 = vector.shape_cast %0 : vector<1x8x128xf32> to vector<8x128xf32>
    %c0_2 = arith.constant 0 : index
    %c0_3 = arith.constant 0 : index
    %2 = vector.load %arg6[%c0_2, %c0_3] : memref<8x256xf32, #tpu.memory_space<vmem>>, vector<8x128xf32>
    tpu.vector_store %arg6[%c0_2, %c0_3], %1 {strides = array<i32>} : memref<8x256xf32, #tpu.memory_space<vmem>>, vector<8x128xf32>,
    %c0_4 = arith.constant 0 : index
    %c0_5 = arith.constant 0 : index
    %c0_6 = arith.constant 0 : index
    %3 = vector.load %arg3[%c0_4, %c0_5, %c0_6] : memref<1x8x128xf32, #tpu.memory_space<vmem>>, vector<1x8x128xf32>
    %4 = vector.shape_cast %3 : vector<1x8x128xf32> to vector<8x128xf32>
    %c0_7 = arith.constant 0 : index
    %c128 = arith.constant 128 : index
    %5 = vector.load %arg6[%c0_7, %c128] : memref<8x256xf32, #tpu.memory_space<vmem>>, vector<8x128xf32>
    tpu.vector_store %arg6[%c0_7, %c128], %4 {strides = array<i32>} : memref<8x256xf32, #tpu.memory_space<vmem>>, vector<8x128xf32>,
    %c0_8 = arith.constant 0 : index
    %c0_9 = arith.constant 0 : index
    %6 = vector.load %arg6[%c0_8, %c0_9] : memref<8x256xf32, #tpu.memory_space<vmem>>, vector<8x256xf32>
    %7 = vector.extract_strided_slice %6 {offsets = [0, 0], sizes = [8, 128], strides = [1, 1]} : vector<8x256xf32> to vector<8x128xf32>
    %c0_10 = arith.constant 0 : index
    %c0_11 = arith.constant 0 : index
    %8 = vector.load %arg7[%c0_10, %c0_11] : memref<88x128xf32, #tpu.memory_space<vmem>>, vector<8x128xf32>
    tpu.vector_store %arg7[%c0_10, %c0_11], %7 {strides = array<i32>} : memref<88x128xf32, #tpu.memory_space<vmem>>, vector<8x128xf32>,
    %9 = vector.extract_strided_slice %6 {offsets = [0, 1], sizes = [8, 128], strides = [1, 1]} : vector<8x256xf32> to vector<8x128xf32>
    %c8 = arith.constant 8 : index
    %c0_12 = arith.constant 0 : index
    %10 = vector.load %arg7[%c8, %c0_12] : memref<88x128xf32, #tpu.memory_space<vmem>>, vector<8x128xf32>
    tpu.vector_store %arg7[%c8, %c0_12], %9 {strides = array<i32>} : memref<88x128xf32, #tpu.memory_space<vmem>>, vector<8x128xf32>,
    %11 = vector.extract_strided_slice %6 {offsets = [0, 2], sizes = [8, 128], strides = [1, 1]} : vector<8x256xf32> to vector<8x128xf32>
    %c16 = arith.constant 16 : index
    %c0_13 = arith.constant 0 : index
    %12 = vector.load %arg7[%c16, %c0_13] : memref<88x128xf32, #tpu.memory_space<vmem>>, vector<8x128xf32>
    tpu.vector_store %arg7[%c16, %c0_13], %11 {strides = array<i32>} : memref<88x128xf32, #tpu.memory_space<vmem>>, vector<8x128xf32>,
    %13 = vector.extract_strided_slice %6 {offsets = [0, 3], sizes = [8, 128], strides = [1, 1]} : vector<8x256xf32> to vector<8x128xf32>
    %c24 = arith.constant 24 : index
    %c0_14 = arith.constant 0 : index
    %14 = vector.load %arg7[%c24, %c0_14] : memref<88x128xf32, #tpu.memory_space<vmem>>, vector<8x128xf32>
    tpu.vector_store %arg7[%c24, %c0_14], %13 {strides = array<i32>} : memref<88x128xf32, #tpu.memory_space<vmem>>, vector<8x128xf32>,
    %15 = vector.extract_strided_slice %6 {offsets = [0, 4], sizes = [8, 128], strides = [1, 1]} : vector<8x256xf32> to vector<8x128xf32>
    %c32 = arith.constant 32 : index
    %c0_15 = arith.constant 0 : index
    %16 = vector.load %arg7[%c32, %c0_15] : memref<88x128xf32, #tpu.memory_space<vmem>>, vector<8x128xf32>
    tpu.vector_store %arg7[%c32, %c0_15], %15 {strides = array<i32>} : memref<88x128xf32, #tpu.memory_space<vmem>>, vector<8x128xf32>,
    %17 = vector.extract_strided_slice %6 {offsets = [0, 5], sizes = [8, 128], strides = [1, 1]} : vector<8x256xf32> to vector<8x128xf32>
    %c40 = arith.constant 40 : index
    %c0_16 = arith.constant 0 : index
    %18 = vector.load %arg7[%c40, %c0_16] : memref<88x128xf32, #tpu.memory_space<vmem>>, vector<8x128xf32>
    tpu.vector_store %arg7[%c40, %c0_16], %17 {strides = array<i32>} : memref<88x128xf32, #tpu.memory_space<vmem>>, vector<8x128xf32>,
    %19 = vector.extract_strided_slice %6 {offsets = [0, 6], sizes = [8, 128], strides = [1, 1]} : vector<8x256xf32> to vector<8x128xf32>
    %c48 = arith.constant 48 : index
    %c0_17 = arith.constant 0 : index
    %20 = vector.load %arg7[%c48, %c0_17] : memref<88x128xf32, #tpu.memory_space<vmem>>, vector<8x128xf32>
    tpu.vector_store %arg7[%c48, %c0_17], %19 {strides = array<i32>} : memref<88x128xf32, #tpu.memory_space<vmem>>, vector<8x128xf32>,
    %21 = vector.extract_strided_slice %6 {offsets = [0, 7], sizes = [8, 128], strides = [1, 1]} : vector<8x256xf32> to vector<8x128xf32>
    %c56 = arith.constant 56 : index
    %c0_18 = arith.constant 0 : index
    %22 = vector.load %arg7[%c56, %c0_18] : memref<88x128xf32, #tpu.memory_space<vmem>>, vector<8x128xf32>
    tpu.vector_store %arg7[%c56, %c0_18], %21 {strides = array<i32>} : memref<88x128xf32, #tpu.memory_space<vmem>>, vector<8x128xf32>,
    %23 = vector.extract_strided_slice %6 {offsets = [0, 8], sizes = [8, 128], strides = [1, 1]} : vector<8x256xf32> to vector<8x128xf32>
    %c64 = arith.constant 64 : index
    %c0_19 = arith.constant 0 : index
    %24 = vector.load %arg7[%c64, %c0_19] : memref<88x128xf32, #tpu.memory_space<vmem>>, vector<8x128xf32>
    tpu.vector_store %arg7[%c64, %c0_19], %23 {strides = array<i32>} : memref<88x128xf32, #tpu.memory_space<vmem>>, vector<8x128xf32>,
    %25 = vector.extract_strided_slice %6 {offsets = [0, 9], sizes = [8, 128], strides = [1, 1]} : vector<8x256xf32> to vector<8x128xf32>
    %c72 = arith.constant 72 : index
    %c0_20 = arith.constant 0 : index
    %26 = vector.load %arg7[%c72, %c0_20] : memref<88x128xf32, #tpu.memory_space<vmem>>, vector<8x128xf32>
    tpu.vector_store %arg7[%c72, %c0_20], %25 {strides = array<i32>} : memref<88x128xf32, #tpu.memory_space<vmem>>, vector<8x128xf32>,
    %27 = vector.extract_strided_slice %6 {offsets = [0, 10], sizes = [8, 128], strides = [1, 1]} : vector<8x256xf32> to vector<8x128xf32>
    %c80 = arith.constant 80 : index
    %c0_21 = arith.constant 0 : index
    %28 = vector.load %arg7[%c80, %c0_21] : memref<88x128xf32, #tpu.memory_space<vmem>>, vector<8x128xf32>
    tpu.vector_store %arg7[%c80, %c0_21], %27 {strides = array<i32>} : memref<88x128xf32, #tpu.memory_space<vmem>>, vector<8x128xf32>,
    %c0_22 = arith.constant 0 : index
    %c0_23 = arith.constant 0 : index
    %29 = vector.load %arg4[%c0_22, %c0_23] : memref<256x88xf32, #tpu.memory_space<vmem>>, vector<256x88xf32>
    %c0_24 = arith.constant 0 : index
    %c0_25 = arith.constant 0 : index
    %30 = vector.load %arg7[%c0_24, %c0_25] : memref<88x128xf32, #tpu.memory_space<vmem>>, vector<88x128xf32>
    %cst = arith.constant dense<0.000000e+00> : vector<256x128xf32>
    %31 = tpu.matmul %29, %30, %cst {dimension_numbers = #tpu.dot_dimension_numbers<[1], [0], [0], [1], [0, 0, 1, 1], [], []>} : vector<256x88xf32>, vector<88x128xf32>, vector<256x128xf32> -> vector<256x128xf32>
    %cst_26 = arith.constant 0.000000e+00 : f32
    %32 = vector.broadcast %cst_26 : f32 to vector<256x128xf32>
    %33 = arith.maximumf %31, %32 : vector<256x128xf32>
    %c0_27 = arith.constant 0 : index
    %c0_28 = arith.constant 0 : index
    %c0_29 = arith.constant 0 : index
    %34 = vector.load %arg5[%c0_27, %c0_28, %c0_29] : memref<1x256x128xf32, #tpu.memory_space<vmem>>, vector<1x256x128xf32>
    %35 = vector.shape_cast %34 : vector<1x256x128xf32> to vector<256x128xf32>
    %36 = vector.shape_cast %33 : vector<256x128xf32> to vector<1x256x128xf32>
    tpu.vector_store %arg5[%c0_27, %c0_28, %c0_29], %36 {strides = array<i32>} : memref<1x256x128xf32, #tpu.memory_space<vmem>>, vector<1x256x128xf32>,
    return
  }
  func.func @transform_0(%arg0: i32, %arg1: i32) -> (i32, i32, i32) {
    %c0_i32 = arith.constant 0 : i32
    %c0_i32_0 = arith.constant 0 : i32
    return %arg0, %c0_i32, %arg1 : i32, i32, i32
  }
  func.func @transform_1(%arg0: i32, %arg1: i32) -> (i32, i32, i32) {
    %c1_i32 = arith.constant 1 : i32
    %0 = arith.addi %arg1, %c1_i32 : i32
    %c1_i32_0 = arith.constant 1 : i32
    %1 = arith.muli %0, %c1_i32_0 : i32
    %c0_i32 = arith.constant 0 : i32
    %c0_i32_1 = arith.constant 0 : i32
    return %arg0, %c0_i32, %1 : i32, i32, i32
  }
  func.func @transform_2(%arg0: i32, %arg1: i32) -> (i32, i32) {
    %c0_i32 = arith.constant 0 : i32
    %c0_i32_0 = arith.constant 0 : i32
    %c0_i32_1 = arith.constant 0 : i32
    return %c0_i32, %c0_i32_0 : i32, i32
  }
  func.func @transform_3(%arg0: i32, %arg1: i32) -> (i32, i32, i32) {
    %c0_i32 = arith.constant 0 : i32
    %c0_i32_0 = arith.constant 0 : i32
    return %arg0, %c0_i32, %arg1 : i32, i32, i32
  }
}

</mosaic_0001>

<bundles_post_ra>
// kernel: tpu_custom_call.1
= control target key start
LH: loop header
LB: loop body
LE: loop exit
PB: predicated region body
PF: predicated region fallthrough
CT: control target
= control target key end

     0   :  { %8 = vsyncpa [#allocation5], 0  ;;  %s1339_s0 = inlined_call_operand.vmem [shape: f32[2,8,256], index: 0, kind: input, shape index: {}]   ;;  %s1340_s1 = inlined_call_operand.vmem [shape: f32[2,8,256], index: 1, kind: input, shape index: {}]   ;;  %s1341_s2 = inlined_call_operand.vmem [shape: f32[256,88], index: 2, kind: input, shape index: {}]   ;;  %s1342_s3 = inlined_call_operand.hbm [shape: f32[2,256,128], index: 3, kind: output, shape index: {}]  }
   0x1   :  { %10 = vsyncpa [#allocation5 + $0x1], 0  ;;  %s1065_s12 = smov 0   ;;  %s1067_s13 = smov 0  }
   0x2   :  { %s1069_s14 = smov 0   ;;  %s1071_s15 = smov 0  }
   0x3   :  { %s1073_s16 = smov 0   ;;  %s1075_s17 = smov 0  }
   0x4 LB: > { %s751_s18 = sadd.s32 4294967295, %s1031_s17   ;;  %s752_s19 = sadd.s32 4294967294, %s1031_s17   ;;  %s1031_s17 = sphi %s1075_s17, %s16_s17   ;;  %s1027_s16 = sphi %s1073_s16, %s1349_s16   ;;  %s1023_s15 = sphi %s1071_s15, %s1348_s15   ;;  %s1019_s14 = sphi %s1069_s14, %s1347_s14   ;;  %s1015_s13 = sphi %s1067_s13, %s1346_s13   ;;  %s1011_s12 = sphi %s1065_s12, %s1345_s12  }
   0x5   : > { %s28_s20 = sadd.s32 1, %s1027_s16  ;;  %s116_s21 = sadd.s32 1, %s1019_s14 }
   0x6   : > { %p30_p0 = scmp.ge.s32.totalorder %s28_s20, 2  ;;  %p126_p1 = scmp.ne.s32.totalorder %s1019_s14, %s1015_s13 }
   0x7   : > { %p127_p2 = scmp.eq.s32.totalorder %s751_s18, 1  ;;  %p132_p3 = scmp.ne.s32.totalorder %s1015_s13, %s1011_s12 }
   0x8   : > { %s1351_s20 = smov (%p30_p0, %s28_s20), 0  ;;  %p133_p5 = scmp.eq.s32.totalorder %s752_s19, 1 }
   0x9   : > { %p1105_p4 = por %p127_p2, %p126_p1  ;;  %s111_s23 = ssub.s32 %s1027_s16, %s1351_s20 }
   0xa   : > { %p755_p6 = scmp.ge.s32.totalorder %s1031_s17, 1  ;;  %p114_p7 = scmp.eq.s32.totalorder %s111_s23, 0 }
   0xb   : > { %p1112_p8 = por %p133_p5, %p132_p3  ;;  %p178_p9 = scmp.lt.s32.totalorder %s1031_s17, 3 }
   0xc   : > { %s1118_s25 = scalar_select %p114_p7, %s1019_s14, %s116_s21  }
   0xd   : > { %p179_p10 = pnand %p755_p6, %p178_p9 }
   0xe   : > { %p214_p11 = scmp.lt.s32.totalorder (!%p179_p10), %s1023_s15, 1  ;;  %s1033_s8 = smov (!%p179_p10), 118  }
   0xf   : > { %182 = sbr.rel (%p179_p10) target bundleno = 369 (0x171), region = 32  ;;  %s1034_s9 = smov (!%p179_p10), 120  }
  0x10   : > { %s1035_s10 = smov (!%p179_p10), 122   ;;  %s1036_s11 = smov (!%p179_p10), 119  }
  0x11   : > { %s1037_s18 = smov (!%p179_p10), 121   ;;  %s1038_s19 = smov (!%p179_p10), 123  }
  0x12   : > { %s1039_s21 = smov (!%p179_p10), 124   ;;  %s1040_s23 = smov (!%p179_p10), 125  }
  0x14   : > { %s215_s26 = scalar_select %p214_p11, %s1023_s15, 1  ;;  %vm317_vm0 = vcmask 965632   ;;  %vm309_vm1 = vcmask 973824   ;;  %vm301_vm2 = vcmask 982016   ;;  %vm293_vm3 = vcmask 990208   ;;  %v337_v43 = vld [vmem:[%s1341_s2 + $0x80] sm:$0xff] }
  0x15   : > { %vm285_vm4 = vcmask 998400   ;;  %vm277_vm5 = vcmask 1006592   ;;  %vm269_vm6 = vcmask 1014784   ;;  %vm261_vm7 = vcmask 1022976   ;;  %v345_v44 = vld [vmem:[%s1341_s2 + $0xc0] sm:$0xff]  ;;  %v338_v47 = vld [vmem:[%s1341_s2 + $0x88] sm:$0xff] }
  0x16   : > { %s798_s27 = sshll.u32 %s215_s26, 4  ;;  %s1041_s26 = smov 126   ;;  %vm253_vm8 = vcmask 1031168   ;;  %vm245_vm9 = vcmask 1039360   ;;  %vm364_vm10 = vcmask 719872   ;;  %v321_v45 = vld [vmem:[%s1341_s2] sm:$0xff] }
  0x17   : > { %s221_s30 = scalar_lea.vmem %s1339_s0, %s798_s27  ;;  %s800_s4 = sadd.s32 8, %s798_s27  ;;  %v329_v46 = vld [vmem:[%s1341_s2 + $0x40] sm:$0xff]  ;;  %v346_v48 = vld [vmem:[%s1341_s2 + $0xc8] sm:$0xff]  ;;  %v339_v51 = vld [vmem:[%s1341_s2 + $0x90] sm:$0xff] }
  0x18   : > { %s230_s7 = scalar_lea.vmem %s1340_s1, %s800_s4  ;;  %v1128_v0 = vld [vmem:[%s221_s30] sm:$0xff]  ;;  %s1042_s27 = smov 127   ;;  %v322_v49 = vld [vmem:[%s1341_s2 + $0x8] sm:$0xff]  ;;  %v347_v52 = vld [vmem:[%s1341_s2 + $0xd0] sm:$0xff] }
  0x19   : > { %v234_v1 = vld [vmem:[%s230_s7] sm:$0xff]  ;;  %v330_v50 = vld [vmem:[%s1341_s2 + $0x48] sm:$0xff]  ;;  %v323_v53 = vld [vmem:[%s1341_s2 + $0x10] sm:$0xff] }
  0x1a   : > { %v903_v2 = vpack.i.bf16 %v234_v1, %v1128_v0  ;;  %v331_v54 = vld [vmem:[%s1341_s2 + $0x50] sm:$0xff]  ;;  %v340_v55 = vld [vmem:[%s1341_s2 + $0x98] sm:$0xff]  ;;  %v341_v59 = vld [vmem:[%s1341_s2 + $0xa0] sm:$0xff] }
  0x1b   : > { %v348_v56 = vld [vmem:[%s1341_s2 + $0xd8] sm:$0xff]  ;;  %v349_v60 = vld [vmem:[%s1341_s2 + $0xe0] sm:$0xff]  ;;  %v342_v63 = vld [vmem:[%s1341_s2 + $0xa8] sm:$0xff] }
  0x1c   : > { %904 = vrot.lane.b32.xlu0 %v903_v2, %s1033_s8  ;;  %914 = vrot.lane.b32.xlu1 %v903_v2, %s1034_s9  ;;  %v324_v57 = vld [vmem:[%s1341_s2 + $0x18] sm:$0xff]  ;;  %v325_v61 = vld [vmem:[%s1341_s2 + $0x20] sm:$0xff] }
  0x1d   : > { %924 = vrot.lane.b32.xlu2 %v903_v2, %s1035_s10  ;;  %v332_v58 = vld [vmem:[%s1341_s2 + $0x58] sm:$0xff]  ;;  %v333_v62 = vld [vmem:[%s1341_s2 + $0x60] sm:$0xff]  ;;  %v326_v1 = vld [vmem:[%s1341_s2 + $0x28] sm:$0xff]  ;;  %s973_s10 = scalar_lea.hbm %s1342_s3, 512 }
  0x24   : > { %909 = vrot.lane.b32.xlu0 %v903_v2, %s1036_s11  ;;  %919 = vrot.lane.b32.xlu1 %v903_v2, %s1037_s18 }
  0x25   : > { %929 = vrot.lane.b32.xlu2 %v903_v2, %s1038_s19 }
  0x2c   : > { %934 = vrot.lane.b32.xlu0 %v903_v2, %s1039_s21  ;;  %939 = vrot.lane.b32.xlu1 %v903_v2, %s1040_s23  ;;  %s211_s21 = sand.u32 1, %s1015_s13  }
  0x2d   : > { %944 = vrot.lane.b32.xlu2 %v903_v2, %s1041_s26  ;;  %s756_s23 = sshll.u32 %s211_s21, 8 }
  0x2e   : > { %s1266_s26 = scalar_lea.vmem [#allocation4], %s756_s23 }
  0x2f   : > { %s652_s4 = sshll.u32 %s1266_s26, 4  ;;  %s653_s4 = int_to_ptr.vmem [resolvable:$true] %s652_s4 }
  0x34   : > { %949 = vrot.lane.b32.xlu0 %v903_v2, %s1042_s27  ;;  %v334_v2 = vld [vmem:[%s1341_s2 + $0x68] sm:$0xff]  ;;  %s801_s27 = sshll.u32 %s1023_s15, 8  ;;  %s639_s15 = scalar_lea.sflag [#allocation5], %s211_s21 }
  0x35   : > { %s651_s30 = scalar_lea.hbm %s1342_s3, %s801_s27 }
  0x36   : > { %s654_s5 = sshll.u32 %s651_s30, 4  ;;  %s655_s5 = int_to_ptr.hbm [resolvable:$true] %s654_s5 }
  0x37   : > { %s967_s6 = sshra.s32 %s655_s5, 4  ;;  %s968_s6 = int_to_ptr.hbm [resolvable:$true] %s967_s6 }
  0x38   : > { %s969_s7 = scalar_lea.hbm %s968_s6, 256  ;;  %p974_p1 = scmp.lt.s32.totalorder %s968_s6, %s1342_s3 }
  0x39   : > { %p970_p12 = scmp.ne.s32.totalorder %s968_s6, %s969_s7  ;;  %p975_p2 = scmp.lt.s32.totalorder %s973_s10, %s969_s7 }
  0x3b   : > { %p971_p13 = pnand %p970_p12, %p1105_p4  ;;  %p976_p3 = por %p975_p2, %p974_p1 }
  0x3d   : > { %p972_p0 = pneg %p971_p13 }
  0x3f   : > { %p977_p5 = pnand %p976_p3, %p972_p0 }
  0x77   : > { %v925_v3 = vpop.permute.xlu2 %924 }
  0x78   : > { %v927_v19 = vunpack.i.h.bf16 %v925_v3  ;;  %v926_v20 = vunpack.i.l.bf16 %v925_v3  ;;  %v343_v3 = vld [vmem:[%s1341_s2 + $0xb0] sm:$0xff] }
  0x7a   : > { %v286_v27 = vsel %vm285_vm4, %v926_v20, %v927_v19 }
  0x7f   : > { %v930_v9 = vpop.permute.xlu2 %929 }
  0x80   : > { %v932_v23 = vunpack.i.h.bf16 %v930_v9  ;;  %v931_v24 = vunpack.i.l.bf16 %v930_v9  ;;  %v328_v9 = vld [vmem:[%s1341_s2 + $0x38] sm:$0xff] }
  0x82   : > { %v278_v33 = vsel %vm277_vm5, %v931_v24, %v932_v23 }
  0x87   : > { %v945_v25 = vpop.permute.xlu2 %944 }
  0x88   : > { %v947_v34 = vunpack.i.h.bf16 %v945_v25  ;;  %v946_v35 = vunpack.i.l.bf16 %v945_v25 }
  0x8a   : > { %v254_v38 = vsel %vm253_vm8, %v946_v35, %v947_v34 }
  0x8e   : > { %v905_v4 = vpop.permute.xlu0 %904  ;;  %v915_v5 = vpop.permute.xlu1 %914 }
  0x8f   : > { %v907_v6 = vunpack.i.h.bf16 %v905_v4  ;;  %v906_v7 = vunpack.i.l.bf16 %v905_v4  ;;  %v917_v10 = vunpack.i.h.bf16 %v915_v5  ;;  %v916_v11 = vunpack.i.l.bf16 %v915_v5  ;;  %v351_v4 = vld [vmem:[%s1341_s2 + $0xf0] sm:$0xff] }
  0x90   : > { %v327_v5 = vld [vmem:[%s1341_s2 + $0x30] sm:$0xff] }
  0x91   : > { %v318_v8 = vsel %vm317_vm0, %v906_v7, %v907_v6  ;;  %v302_v21 = vsel %vm301_vm2, %v916_v11, %v917_v10  ;;  %v335_v6 = vld [vmem:[%s1341_s2 + $0x70] sm:$0xff]  ;;  %v344_v7 = vld [vmem:[%s1341_s2 + $0xb8] sm:$0xff] }
  0x92   : > { %466 = vmatpush.msra.mxu0 %v318_v8  ;;  %803 = vmatpush.msra.mxu1 %v318_v8  ;;  %v336_v10 = vld [vmem:[%s1341_s2 + $0x78] sm:$0xff] }
  0x93   : > { %804 = vmatpush.msra.mxu2 %v318_v8  ;;  %805 = vmatpush.msra.mxu3 %v318_v8  ;;  %v352_v8 = vld [vmem:[%s1341_s2 + $0xf8] sm:$0xff] }
  0x96   : > { %v910_v12 = vpop.permute.xlu0 %909  ;;  %v920_v13 = vpop.permute.xlu1 %919 }
  0x97   : > { %v912_v14 = vunpack.i.h.bf16 %v910_v12  ;;  %v911_v15 = vunpack.i.l.bf16 %v910_v12  ;;  %v922_v16 = vunpack.i.h.bf16 %v920_v13  ;;  %v921_v17 = vunpack.i.l.bf16 %v920_v13 }
  0x99   : > { %v310_v18 = vsel %vm309_vm1, %v911_v15, %v912_v14  ;;  %v294_v22 = vsel %vm293_vm3, %v921_v17, %v922_v16 }
  0x9a   : > { %467 = vmatpush.msra.mxu0 %v310_v18  ;;  %806 = vmatpush.msra.mxu1 %v310_v18 }
  0x9b   : > { %807 = vmatpush.msra.mxu2 %v310_v18  ;;  %808 = vmatpush.msra.mxu3 %v310_v18 }
  0x9c   : > { %468 = vmatpush.msra.mxu0 %v302_v21  ;;  %809 = vmatpush.msra.mxu1 %v302_v21 }
  0x9d   : > { %810 = vmatpush.msra.mxu2 %v302_v21  ;;  %811 = vmatpush.msra.mxu3 %v302_v21 }
  0x9e   : > { %v935_v26 = vpop.permute.xlu0 %934  ;;  %469 = vmatpush.msra.mxu0 %v294_v22  ;;  %812 = vmatpush.msra.mxu1 %v294_v22  ;;  %v940_v28 = vpop.permute.xlu1 %939 }
  0x9f   : > { %v937_v29 = vunpack.i.h.bf16 %v935_v26  ;;  %v936_v30 = vunpack.i.l.bf16 %v935_v26  ;;  %813 = vmatpush.msra.mxu2 %v294_v22  ;;  %814 = vmatpush.msra.mxu3 %v294_v22  ;;  %v942_v31 = vunpack.i.h.bf16 %v940_v28  ;;  %v941_v32 = vunpack.i.l.bf16 %v940_v28 }
  0xa0   : > { %470 = vmatpush.msra.mxu0 %v286_v27  ;;  %815 = vmatpush.msra.mxu1 %v286_v27 }
  0xa1   : > { %816 = vmatpush.msra.mxu2 %v286_v27  ;;  %817 = vmatpush.msra.mxu3 %v286_v27  ;;  %v270_v36 = vsel %vm269_vm6, %v936_v30, %v937_v29  ;;  %v262_v37 = vsel %vm261_vm7, %v941_v32, %v942_v31 }
  0xa2   : > { %471 = vmatpush.msra.mxu0 %v278_v33  ;;  %818 = vmatpush.msra.mxu1 %v278_v33 }
  0xa3   : > { %819 = vmatpush.msra.mxu2 %v278_v33  ;;  %820 = vmatpush.msra.mxu3 %v278_v33 }
  0xa4   : > { %472 = vmatpush.msra.mxu0 %v270_v36  ;;  %821 = vmatpush.msra.mxu1 %v270_v36 }
  0xa5   : > { %822 = vmatpush.msra.mxu2 %v270_v36  ;;  %823 = vmatpush.msra.mxu3 %v270_v36 }
  0xa6   : > { %v950_v39 = vpop.permute.xlu0 %949  ;;  %473 = vmatpush.msra.mxu0 %v262_v37  ;;  %824 = vmatpush.msra.mxu1 %v262_v37 }
  0xa7   : > { %v952_v40 = vunpack.i.h.bf16 %v950_v39  ;;  %v951_v41 = vunpack.i.l.bf16 %v950_v39  ;;  %825 = vmatpush.msra.mxu2 %v262_v37  ;;  %826 = vmatpush.msra.mxu3 %v262_v37 }
  0xa8   : > { %474 = vmatpush.msra.mxu0 %v254_v38  ;;  %827 = vmatpush.msra.mxu1 %v254_v38 }
  0xa9   : > { %828 = vmatpush.msra.mxu2 %v254_v38  ;;  %829 = vmatpush.msra.mxu3 %v254_v38  ;;  %v246_v42 = vsel %vm245_vm9, %v951_v41, %v952_v40 }
  0xaa   : > { %475 = vmatpush.msra.mxu0 %v246_v42  ;;  %830 = vmatpush.msra.mxu1 %v246_v42 }
  0xab   : > { %831 = vmatpush.msra.mxu2 %v246_v42  ;;  %832 = vmatpush.msra.mxu3 %v246_v42 }
  0xac   : > { %476 = vmatpush.msra.mxu0 %v1128_v0  ;;  %833 = vmatpush.msra.mxu1 %v1128_v0 }
  0xad   : > { %834 = vmatpush.msra.mxu2 %v1128_v0  ;;  %835 = vmatpush.msra.mxu3 %v1128_v0  ;;  %v350_v0 = vld [vmem:[%s1341_s2 + $0xe8] sm:$0xff] }
  0xae   : > { %777 = vmatmul.msk.f32.vlgmr.msra.gmra.mxu2 %vm364_vm10, %v337_v43  ;;  %785 = vmatmul.msk.f32.vlgmr.msra.gmra.mxu3 %vm364_vm10, %v345_v44 }
  0xaf   : > { %761 = vmatmul.msk.f32.vlgmr.msra.gmra.mxu0 %vm364_vm10, %v321_v45  ;;  %769 = vmatmul.msk.f32.vlgmr.msra.gmra.mxu1 %vm364_vm10, %v329_v46 }
  0xb6   : > { %778 = vmatmul.msk.f32.gmra.mxu2 %vm364_vm10, %v338_v47  ;;  %786 = vmatmul.msk.f32.gmra.mxu3 %vm364_vm10, %v346_v48 }
  0xb7   : > { %762 = vmatmul.msk.f32.gmra.mxu0 %vm364_vm10, %v322_v49  ;;  %770 = vmatmul.msk.f32.gmra.mxu1 %vm364_vm10, %v330_v50 }
  0xbe   : > { %779 = vmatmul.msk.f32.gmra.mxu2 %vm364_vm10, %v339_v51  ;;  %787 = vmatmul.msk.f32.gmra.mxu3 %vm364_vm10, %v347_v52 }
  0xbf   : > { %763 = vmatmul.msk.f32.gmra.mxu0 %vm364_vm10, %v323_v53  ;;  %771 = vmatmul.msk.f32.gmra.mxu1 %vm364_vm10, %v331_v54 }
  0xc6   : > { %780 = vmatmul.msk.f32.gmra.mxu2 %vm364_vm10, %v340_v55  ;;  %788 = vmatmul.msk.f32.gmra.mxu3 %vm364_vm10, %v348_v56 }
  0xc7   : > { %764 = vmatmul.msk.f32.gmra.mxu0 %vm364_vm10, %v324_v57  ;;  %772 = vmatmul.msk.f32.gmra.mxu1 %vm364_vm10, %v332_v58 }
  0xce   : > { %781 = vmatmul.msk.f32.gmra.mxu2 %vm364_vm10, %v341_v59  ;;  %789 = vmatmul.msk.f32.gmra.mxu3 %vm364_vm10, %v349_v60 }
  0xcf   : > { %765 = vmatmul.msk.f32.gmra.mxu0 %vm364_vm10, %v325_v61  ;;  %773 = vmatmul.msk.f32.gmra.mxu1 %vm364_vm10, %v333_v62 }
  0xd6   : > { %782 = vmatmul.msk.f32.gmra.mxu2 %vm364_vm10, %v342_v63  ;;  %790 = vmatmul.msk.f32.gmra.mxu3 %vm364_vm10, %v350_v0 }
  0xd7   : > { %766 = vmatmul.msk.f32.gmra.mxu0 %vm364_vm10, %v326_v1  ;;  %774 = vmatmul.msk.f32.gmra.mxu1 %vm364_vm10, %v334_v2 }
  0xde   : > { %783 = vmatmul.msk.f32.gmra.mxu2 %vm364_vm10, %v343_v3  ;;  %791 = vmatmul.msk.f32.gmra.mxu3 %vm364_vm10, %v351_v4 }
  0xdf   : > { %767 = vmatmul.msk.f32.gmra.mxu0 %vm364_vm10, %v327_v5  ;;  %775 = vmatmul.msk.f32.gmra.mxu1 %vm364_vm10, %v335_v6 }
  0xe6   : > { %784 = vmatmul.msk.f32.gmra.mxu2 %vm364_vm10, %v344_v7  ;;  %792 = vmatmul.msk.f32.gmra.mxu3 %vm364_vm10, %v352_v8 }
  0xe7   : > { %768 = vmatmul.msk.f32.gmra.mxu0 %vm364_vm10, %v328_v9  ;;  %776 = vmatmul.msk.f32.gmra.mxu1 %vm364_vm10, %v336_v10 }
 0x12c   : > { %v478_v11 = vpop.f32.mrf.mxu0  ;;  %v502_v12 = vpop.f32.mrf.mxu1 }
 0x12d   : > { %v574_v13 = vmax.f32 %v478_v11, 0.0  ;;  %v582_v14 = vmax.f32 %v502_v12, 0.0 }
 0x12f   : > { %606 = vst [vmem:[%s1266_s26] sm:$0xff] %v574_v13 }
 0x130   : > { %614 = vst [vmem:[%s1266_s26 + $0x40] sm:$0xff] %v582_v14 }
 0x131   : > { %v526_v15 = vpop.f32.mrf.mxu2  ;;  %v550_v16 = vpop.f32.mrf.mxu3 }
 0x132   : > { %v590_v17 = vmax.f32 %v526_v15, 0.0  ;;  %v598_v18 = vmax.f32 %v550_v16, 0.0 }
 0x134   : > { %622 = vst [vmem:[%s1266_s26 + $0x80] sm:$0xff] %v590_v17  ;;  %v481_v19 = vpop.f32.mrf.mxu0  ;;  %v505_v20 = vpop.f32.mrf.mxu1 }
 0x135   : > { %630 = vst [vmem:[%s1266_s26 + $0xc0] sm:$0xff] %v598_v18  ;;  %v575_v21 = vmax.f32 %v481_v19, 0.0  ;;  %v583_v22 = vmax.f32 %v505_v20, 0.0 }
 0x137   : > { %607 = vst [vmem:[%s1266_s26 + $0x8] sm:$0xff] %v575_v21 }
 0x138   : > { %615 = vst [vmem:[%s1266_s26 + $0x48] sm:$0xff] %v583_v22 }
 0x139   : > { %v529_v23 = vpop.f32.mrf.mxu2  ;;  %v553_v24 = vpop.f32.mrf.mxu3 }
 0x13a   : > { %v591_v25 = vmax.f32 %v529_v23, 0.0  ;;  %v599_v26 = vmax.f32 %v553_v24, 0.0 }
 0x13c   : > { %623 = vst [vmem:[%s1266_s26 + $0x88] sm:$0xff] %v591_v25  ;;  %v484_v27 = vpop.f32.mrf.mxu0  ;;  %v508_v28 = vpop.f32.mrf.mxu1 }
 0x13d   : > { %631 = vst [vmem:[%s1266_s26 + $0xc8] sm:$0xff] %v599_v26  ;;  %v576_v29 = vmax.f32 %v484_v27, 0.0  ;;  %v584_v30 = vmax.f32 %v508_v28, 0.0 }
 0x13f   : > { %608 = vst [vmem:[%s1266_s26 + $0x10] sm:$0xff] %v576_v29 }
 0x140   : > { %616 = vst [vmem:[%s1266_s26 + $0x50] sm:$0xff] %v584_v30 }
 0x141   : > { %v532_v31 = vpop.f32.mrf.mxu2  ;;  %v556_v32 = vpop.f32.mrf.mxu3 }
 0x142   : > { %v592_v33 = vmax.f32 %v532_v31, 0.0  ;;  %v600_v34 = vmax.f32 %v556_v32, 0.0 }
 0x144   : > { %624 = vst [vmem:[%s1266_s26 + $0x90] sm:$0xff] %v592_v33  ;;  %v487_v35 = vpop.f32.mrf.mxu0  ;;  %v511_v36 = vpop.f32.mrf.mxu1 }
 0x145   : > { %632 = vst [vmem:[%s1266_s26 + $0xd0] sm:$0xff] %v600_v34  ;;  %v577_v37 = vmax.f32 %v487_v35, 0.0  ;;  %v585_v38 = vmax.f32 %v511_v36, 0.0 }
 0x147   : > { %609 = vst [vmem:[%s1266_s26 + $0x18] sm:$0xff] %v577_v37 }
 0x148   : > { %617 = vst [vmem:[%s1266_s26 + $0x58] sm:$0xff] %v585_v38 }
 0x149   : > { %v535_v39 = vpop.f32.mrf.mxu2  ;;  %v559_v40 = vpop.f32.mrf.mxu3 }
 0x14a   : > { %v593_v41 = vmax.f32 %v535_v39, 0.0  ;;  %v601_v42 = vmax.f32 %v559_v40, 0.0 }
 0x14c   : > { %625 = vst [vmem:[%s1266_s26 + $0x98] sm:$0xff] %v593_v41  ;;  %v490_v43 = vpop.f32.mrf.mxu0  ;;  %v514_v44 = vpop.f32.mrf.mxu1 }
 0x14d   : > { %633 = vst [vmem:[%s1266_s26 + $0xd8] sm:$0xff] %v601_v42  ;;  %v578_v45 = vmax.f32 %v490_v43, 0.0  ;;  %v586_v46 = vmax.f32 %v514_v44, 0.0 }
 0x14f   : > { %610 = vst [vmem:[%s1266_s26 + $0x20] sm:$0xff] %v578_v45 }
 0x150   : > { %618 = vst [vmem:[%s1266_s26 + $0x60] sm:$0xff] %v586_v46 }
 0x151   : > { %v538_v47 = vpop.f32.mrf.mxu2  ;;  %v562_v48 = vpop.f32.mrf.mxu3 }
 0x152   : > { %v594_v49 = vmax.f32 %v538_v47, 0.0  ;;  %v602_v50 = vmax.f32 %v562_v48, 0.0 }
 0x154   : > { %626 = vst [vmem:[%s1266_s26 + $0xa0] sm:$0xff] %v594_v49  ;;  %v493_v51 = vpop.f32.mrf.mxu0  ;;  %v517_v52 = vpop.f32.mrf.mxu1 }
 0x155   : > { %634 = vst [vmem:[%s1266_s26 + $0xe0] sm:$0xff] %v602_v50  ;;  %v579_v53 = vmax.f32 %v493_v51, 0.0  ;;  %v587_v54 = vmax.f32 %v517_v52, 0.0 }
 0x157   : > { %611 = vst [vmem:[%s1266_s26 + $0x28] sm:$0xff] %v579_v53 }
 0x158   : > { %619 = vst [vmem:[%s1266_s26 + $0x68] sm:$0xff] %v587_v54 }
 0x159   : > { %v541_v55 = vpop.f32.mrf.mxu2  ;;  %v565_v56 = vpop.f32.mrf.mxu3 }
 0x15a   : > { %v595_v57 = vmax.f32 %v541_v55, 0.0  ;;  %v603_v58 = vmax.f32 %v565_v56, 0.0 }
 0x15c   : > { %627 = vst [vmem:[%s1266_s26 + $0xa8] sm:$0xff] %v595_v57  ;;  %v496_v59 = vpop.f32.mrf.mxu0  ;;  %v520_v60 = vpop.f32.mrf.mxu1 }
 0x15d   : > { %635 = vst [vmem:[%s1266_s26 + $0xe8] sm:$0xff] %v603_v58  ;;  %v580_v61 = vmax.f32 %v496_v59, 0.0  ;;  %v588_v62 = vmax.f32 %v520_v60, 0.0 }
 0x15f   : > { %612 = vst [vmem:[%s1266_s26 + $0x30] sm:$0xff] %v580_v61 }
 0x160   : > { %620 = vst [vmem:[%s1266_s26 + $0x70] sm:$0xff] %v588_v62 }
 0x161   : > { %v544_v63 = vpop.f32.mrf.mxu2  ;;  %v568_v0 = vpop.f32.mrf.mxu3 }
 0x162   : > { %v596_v1 = vmax.f32 %v544_v63, 0.0  ;;  %v604_v2 = vmax.f32 %v568_v0, 0.0 }
 0x164   : > { %628 = vst [vmem:[%s1266_s26 + $0xb0] sm:$0xff] %v596_v1  ;;  %v499_v3 = vpop.f32.mrf.mxu0  ;;  %v523_v4 = vpop.f32.mrf.mxu1 }
 0x165   : > { %636 = vst [vmem:[%s1266_s26 + $0xf0] sm:$0xff] %v604_v2  ;;  %v581_v5 = vmax.f32 %v499_v3, 0.0  ;;  %v589_v6 = vmax.f32 %v523_v4, 0.0 }
 0x167   : > { %613 = vst [vmem:[%s1266_s26 + $0x38] sm:$0xff] %v581_v5 }
 0x168   : > { %621 = vst [vmem:[%s1266_s26 + $0x78] sm:$0xff] %v589_v6 }
 0x169   : > { %v547_v7 = vpop.f32.mrf.mxu2  ;;  %v571_v8 = vpop.f32.mrf.mxu3 }
 0x16a   : > { %v597_v9 = vmax.f32 %v547_v7, 0.0  ;;  %v605_v10 = vmax.f32 %v571_v8, 0.0 }
 0x16c   : > { %629 = vst [vmem:[%s1266_s26 + $0xb8] sm:$0xff] %v597_v9 }
 0x16d   : > { %637 = vst [vmem:[%s1266_s26 + $0xf8] sm:$0xff] %v605_v10 }
 0x16e   : > { %980 = shalt.err (!%p977_p5)
}
 0x16f   : > { %s1043_s19 = smov 128   ;;  %s1044_s21 = smov 8  }
 0x170   : > { %836 = dma.vmem_to_hbm [thread:$0]  (%p1105_p4), %s653_s4, 4096, %s655_s5, %s639_s15, %s1043_s19, %s1043_s19, %s1044_s21  }
 0x171 PF: > { %p842_p6 = scmp.ge.s32.totalorder %s1031_s17, 2  ;;  %s669_s23 = sand.u32 1, %s1011_s12  }
 0x172   : > { %s670_s26 = scalar_lea.sflag [#allocation5], %s669_s23 }
 0x173   : > { %p839_p7 = pnand %p842_p6, %p1112_p8 }
 0x175   : > { %p840_p9 = pneg %p839_p7 }
 0x177   : > { %1006 = dma.done.wait (%p840_p9), %s670_s26, 4096  }
 0x178   : > { %1008 = vsyncadd (%p840_p9), %s670_s26, 4294963200  ;;  %s16_s17 = sadd.s32 1, %s1031_s17   ;;  %s1345_s12 = smov %s1015_s13 }
 0x179   : > { %p13_p10 = scmp.ge.s32.totalorder %s16_s17, 4   ;;  %s1346_s13 = smov %s1019_s14 }
 0x17a   : > { %s1347_s14 = smov %s1118_s25  ;;  %s1348_s15 = smov %s1027_s16 }
 0x17b   : > { %s1349_s16 = smov %s1351_s20  ;;  %15 = sbr.rel (!%p13_p10) target bundleno = 4 (0x4), region = 70 }
 0x180   :  { %676 = vsyncpa [#allocation5], 1 }
 0x181   :  { %678 = vsyncpa [#allocation5 + $0x1], 1 }

</bundles_post_ra>
